<compile_context>
chip_gen: v5e
topology: v5e:2x2
jax: 0.10.0
libtpu: 0.0.40
codegen_flags: <defaults>
</compile_context>

<pallas_src>
import math

import jax
import jax.numpy as jnp
from jax import lax
from jax.experimental import pallas as pl
from jax.experimental.pallas import tpu as pltpu

_MIB = 1024 * 1024


def _vmem_limit_bytes():
    """Generation-aware VMEM limit: ~40 MiB on v7x (64 MiB/TC), ~100 MiB on v5e/v6e."""
    try:
        cap = pltpu.get_tpu_info().vmem_capacity_bytes
    except Exception:
        cap = 64 * _MIB                      # conservative fallback (v7x-sized)
    return int(max(32 * _MIB, min(cap - 24 * _MIB, 100 * _MIB)))


_VMEM_LIMIT = _vmem_limit_bytes()
_WORK_BUDGET = int(_VMEM_LIMIT * 0.6)        # budget for live tiles + double buffers


def _round_tile(tn, n):
    tn = min(tn, n)
    if tn >= n:
        return n                              # full axis is always layout-legal
    return max(128, (tn // 128) * 128)        # lane dim must be a multiple of 128


def _choose_interp_tile(n, m, c_prev, c_cur, c_out, budget):
    """Pick TN so live (M,TN) intermediates + double-buffered blocks fit the budget."""
    per_lane = 20 * m + 8 * (3 + c_cur + c_out) + 4 * c_prev      # bytes per lane
    fixed = 8 * c_prev * m + 24 * m + 8 * c_out * (c_prev + c_cur)
    avail = max(budget - fixed, 0)
    tn = avail // max(per_lane, 1)
    tn = min(tn, 1024)
    # TODO(synk): for very large M (budget < 128 lanes) also chunk the source-point
    # axis with a running top-3 merge instead of holding full (M, TN) intermediates.
    tn = max(tn, 128)
    return _round_tile(tn, n)


def _choose_conv_tile(n, cin, cout, budget):
    """Bigger tiles amortize the ~0.35us/step pipeline overhead; VMEM use is small."""
    per_lane = 8 * (cin + cout) + 4 * cout
    fixed = 8 * cout * cin + 64 * cin
    avail = max(budget - fixed, 0)
    tn = avail // max(per_lane, 1)
    tn = min(tn, 2048)
    tn = max(tn, 256)
    return _round_tile(tn, n)


# ----------------------------------------------------------------------------
# Kernel 1: three_nn + inverse-distance interpolation + fused layer-0 Conv1d
#           + per-tile BN-stat emission.  grid = (B, N_tiles), all parallel.
# ----------------------------------------------------------------------------
def _make_interp_conv_kernel(has_features, total_n, tile_n, mask_lanes):
    def kernel(*refs):
        if has_features:
            (xyz_ref, xyzp_ref, fprev_ref, feat_ref, wprev_ref, wcur_ref,
             y_ref, st_ref) = refs
        else:
            xyz_ref, xyzp_ref, fprev_ref, wprev_ref, y_ref, st_ref = refs
            feat_ref = wcur_ref = None

        j = pl.program_id(1)

        x = xyz_ref[0].astype(jnp.float32)         # (3, TN)  query coords (channel-first)
        y = xyzp_ref[0].astype(jnp.float32)        # (M, 3)   source coords
        m = y.shape[0]
        tn = x.shape[1]

        # Pairwise SQUARED distances on the VPU (K=3, so no MXU / no transposes):
        # d2[m, t] = sum_c (y[m, c] - x[c, t])^2   -> (M, TN)
        d2 = None
        for c in range(3):
            diff = y[:, c:c + 1] - x[c:c + 1, :]
            sq = diff * diff
            d2 = sq if d2 is None else d2 + sq

        row = lax.broadcasted_iota(jnp.int32, (m, tn), 0)
        big = jnp.float32(1e30)

        # Peel the 3 nearest neighbours on d^2 (argmin order identical under d^2);
        # sqrt only the (1, TN) minima.  Accumulate a sparse weight matrix w (M, TN)
        # and do the interpolation with one MXU matmul.
        w = jnp.zeros((m, tn), jnp.float32)
        inv_sum = jnp.zeros((1, tn), jnp.float32)
        d2_work = d2
        for k in range(3):
            dk2 = jnp.min(d2_work, axis=0, keepdims=True)                  # (1, TN)
            first = jnp.min(jnp.where(d2_work <= dk2, row, m),
                            axis=0, keepdims=True)                          # (1, TN)
            oh = row == first                                               # (M, TN)
            inv_d = 1.0 / (jnp.sqrt(jnp.maximum(dk2, 0.0)) + 1e-8)          # (1, TN)
            w = w + inv_d * oh.astype(jnp.float32)
            inv_sum = inv_sum + inv_d
            if k < 2:
                d2_work = jnp.where(oh, big, d2_work)

        # Exact normalization (divide only over (1, TN); weights sum to exactly 1).
        w = w * (1.0 / inv_sum)                                             # (M, TN)

        fprev = fprev_ref[0].astype(jnp.float32)                            # (Cp, M)
        interp = jnp.dot(fprev, w, preferred_element_type=jnp.float32)      # (Cp, TN)

        # Fused layer-0 1x1 conv: the concat tensor never hits HBM.
        wprev = wprev_ref[...].astype(jnp.float32)                          # (C0, Cp)
        y0 = jnp.dot(wprev, interp, preferred_element_type=jnp.float32)     # (C0, TN)
        if has_features:
            feat = feat_ref[0].astype(jnp.float32)                          # (Cc, TN)
            wcur = wcur_ref[...].astype(jnp.float32)                        # (C0, Cc)
            y0 = y0 + jnp.dot(wcur, feat, preferred_element_type=jnp.float32)

        y_ref[0] = y0.astype(y_ref.dtype)

        if mask_lanes:   # zero the padded lanes of a partial last N tile for stats
            lane = lax.broadcasted_iota(jnp.int32, (1, tile_n), 1) + j * tile_n
            y0 = jnp.where(lane < total_n, y0, 0.0)
        s = jnp.sum(y0, axis=1, keepdims=True)                              # (C0, 1)
        ss = jnp.sum(y0 * y0, axis=1, keepdims=True)                        # (C0, 1)
        st_ref[0, 0] = jnp.concatenate([s, ss], axis=1)

    return kernel


def interpolate_conv0_stats(xyz, xyz_prev, feats_prev_cf, feats_cf, w_prev, w_cur):
    """xyz (B,N,3), xyz_prev (B,M,3), feats_prev_cf (B,Cp,M), feats_cf (B,Cc,N)|None,
    w_prev (C0,Cp), w_cur (C0,Cc)|None.  Returns (y0 (B,C0,N), reduced stats (C0,2))."""
    b, n, _ = xyz.shape
    m = xyz_prev.shape[1]
    c_prev = feats_prev_cf.shape[1]
    has_features = feats_cf is not None
    c_cur = feats_cf.shape[1] if has_features else 0
    c0 = w_prev.shape[0]

    tn = _choose_interp_tile(n, m, c_prev, c_cur, c0, _WORK_BUDGET)
    n_tiles = pl.cdiv(n, tn)
    mask_lanes = (n % tn) != 0

    xyz_cf = jnp.transpose(xyz, (0, 2, 1))     # (B, 3, N) — tiny wrapper transpose

    in_specs = [
        pl.BlockSpec((1, 3, tn), lambda i, j: (i, 0, j)),
        pl.BlockSpec((1, m, 3), lambda i, j: (i, 0, 0)),
        pl.BlockSpec((1, c_prev, m), lambda i, j: (i, 0, 0)),
    ]
    args = [xyz_cf, xyz_prev, feats_prev_cf]
    if has_features:
        in_specs.append(pl.BlockSpec((1, c_cur, tn), lambda i, j: (i, 0, j)))
        args.append(feats_cf)
    in_specs.append(pl.BlockSpec((c0, c_prev), lambda i, j: (0, 0)))
    args.append(w_prev)
    if has_features:
        in_specs.append(pl.BlockSpec((c0, c_cur), lambda i, j: (0, 0)))
        args.append(w_cur)

    y0, stats = pl.pallas_call(
        _make_interp_conv_kernel(has_features, n, tn, mask_lanes),
        out_shape=(jax.ShapeDtypeStruct((b, c0, n), jnp.float32),
                   jax.ShapeDtypeStruct((b, n_tiles, c0, 2), jnp.float32)),
        grid=(b, n_tiles),
        in_specs=in_specs,
        out_specs=(pl.BlockSpec((1, c0, tn), lambda i, j: (i, 0, j)),
                   pl.BlockSpec((1, 1, c0, 2), lambda i, j: (i, j, 0, 0))),
        compiler_params=pltpu.CompilerParams(
            dimension_semantics=("parallel", "parallel"),
            vmem_limit_bytes=_VMEM_LIMIT),
    )(*args)
    return y0, jnp.sum(stats, axis=(0, 1))      # (C0, 2) tiny reduction outside


# ----------------------------------------------------------------------------
# Kernel 2: fused  BN(prev layer) + ReLU  ->  next layer 1x1 conv  -> BN stats.
#           One HBM read + one HBM write of an activation per layer.
# ----------------------------------------------------------------------------
def _make_bn_relu_conv_stats_kernel(count, total_n, tile_n, mask_lanes):
    inv_count = 1.0 / float(count)

    def kernel(x_ref, st_in_ref, g_ref, b_ref, w_ref, y_ref, st_out_ref):
        j = pl.program_id(1)
        x = x_ref[0].astype(jnp.float32)                       # (Cin, TN) pre-BN conv out
        st = st_in_ref[...].astype(jnp.float32)                # (Cin, 2) [sum, sumsq]
        mean = st[:, 0:1] * inv_count
        # TODO(synk): E[x^2]-mean^2 in f32 can lose precision when |mean| >> std
        # (PyTorch uses mean-centered variance); acceptable for this forward pass.
        var = jnp.maximum(st[:, 1:2] * inv_count - mean * mean, 0.0)
        scale = lax.rsqrt(var + 1e-5) * g_ref[...].astype(jnp.float32)
        shift = b_ref[...].astype(jnp.float32) - mean * scale
        a = jnp.maximum(x * scale + shift, 0.0)                # BN + ReLU

        w = w_ref[...].astype(jnp.float32)                     # (Cout, Cin)
        y = jnp.dot(w, a, preferred_element_type=jnp.float32)  # (Cout, TN)
        y_ref[0] = y.astype(y_ref.dtype)

        if mask_lanes:
            lane = lax.broadcasted_iota(jnp.int32, (1, tile_n), 1) + j * tile_n
            y = jnp.where(lane < total_n, y, 0.0)
        s = jnp.sum(y, axis=1, keepdims=True)
        ss = jnp.sum(y * y, axis=1, keepdims=True)
        st_out_ref[0, 0] = jnp.concatenate([s, ss], axis=1)

    return kernel


def bn_relu_conv_stats(y_in, stats_in, gamma, beta, w_next):
    b, cin, n = y_in.shape
    cout = w_next.shape[0]
    tn = _choose_conv_tile(n, cin, cout, _WORK_BUDGET)
    n_tiles = pl.cdiv(n, tn)
    mask_lanes = (n % tn) != 0
    count = b * n

    y_out, stats = pl.pallas_call(
        _make_bn_relu_conv_stats_kernel(count, n, tn, mask_lanes),
        out_shape=(jax.ShapeDtypeStruct((b, cout, n), jnp.float32),
                   jax.ShapeDtypeStruct((b, n_tiles, cout, 2), jnp.float32)),
        grid=(b, n_tiles),
        in_specs=[pl.BlockSpec((1, cin, tn), lambda i, j: (i, 0, j)),
                  pl.BlockSpec((cin, 2), lambda i, j: (0, 0)),
                  pl.BlockSpec((cin, 1), lambda i, j: (0, 0)),
                  pl.BlockSpec((cin, 1), lambda i, j: (0, 0)),
                  pl.BlockSpec((cout, cin), lambda i, j: (0, 0))],
        out_specs=(pl.BlockSpec((1, cout, tn), lambda i, j: (i, 0, j)),
                   pl.BlockSpec((1, 1, cout, 2), lambda i, j: (i, j, 0, 0))),
        compiler_params=pltpu.CompilerParams(
            dimension_semantics=("parallel", "parallel"),
            vmem_limit_bytes=_VMEM_LIMIT),
    )(y_in, stats_in, gamma, beta, w_next)
    return y_out, jnp.sum(stats, axis=(0, 1))


# ----------------------------------------------------------------------------
# Kernel 3: final BN + ReLU (normalize + affine + clamp, lane-dense stores)
# ----------------------------------------------------------------------------
def _make_bn_relu_kernel(count):
    inv_count = 1.0 / float(count)

    def kernel(x_ref, st_ref, g_ref, b_ref, o_ref):
        x = x_ref[0].astype(jnp.float32)                       # (C, TN)
        st = st_ref[...].astype(jnp.float32)                   # (C, 2)
        mean = st[:, 0:1] * inv_count
        var = jnp.maximum(st[:, 1:2] * inv_count - mean * mean, 0.0)
        scale = lax.rsqrt(var + 1e-5) * g_ref[...].astype(jnp.float32)
        shift = b_ref[...].astype(jnp.float32) - mean * scale
        o_ref[0] = jnp.maximum(x * scale + shift, 0.0).astype(o_ref.dtype)

    return kernel


def bn_relu_final(y_in, stats_in, gamma, beta):
    b, c, n = y_in.shape
    tn = _choose_conv_tile(n, c, c, _WORK_BUDGET)
    n_tiles = pl.cdiv(n, tn)
    count = b * n
    return pl.pallas_call(
        _make_bn_relu_kernel(count),
        out_shape=jax.ShapeDtypeStruct((b, c, n), jnp.float32),
        grid=(b, n_tiles),
        in_specs=[pl.BlockSpec((1, c, tn), lambda i, j: (i, 0, j)),
                  pl.BlockSpec((c, 2), lambda i, j: (0, 0)),
                  pl.BlockSpec((c, 1), lambda i, j: (0, 0)),
                  pl.BlockSpec((c, 1), lambda i, j: (0, 0))],
        out_specs=pl.BlockSpec((1, c, tn), lambda i, j: (i, 0, j)),
        compiler_params=pltpu.CompilerParams(
            dimension_semantics=("parallel", "parallel"),
            vmem_limit_bytes=_VMEM_LIMIT),
    )(y_in, stats_in, gamma, beta)


# ----------------------------------------------------------------------------
# Module
# ----------------------------------------------------------------------------
class PointNet2FeaturePropagator:
    def __init__(self, in_channels1, in_channels2, out_channels, batchnorm=True,
                 key=None):
        assert batchnorm, "this port implements the batchnorm=True path"
        self.layer_dims = tuple(out_channels)
        in_channels = in_channels1 + in_channels2
        key = jax.random.PRNGKey(0) if key is None else key
        self.layers = []
        for out_channel in out_channels:
            key, kw = jax.random.split(key)
            bound = 1.0 / math.sqrt(in_channels)
            # Conv1d(in_channels, out_channel, 1) weight, stored (Cout, Cin).
            w = jax.random.uniform(kw, (out_channel, in_channels), jnp.float32,
                                   minval=-bound, maxval=bound)
            gamma = jnp.ones((out_channel, 1), jnp.float32)   # BN weight init
            beta = jnp.zeros((out_channel, 1), jnp.float32)   # BN bias init
            self.layers.append((w, gamma, beta))
            # Conv bias omitted: training-mode BN subtracts the batch mean, so the
            # bias is a mathematically exact no-op.
            # Faithful to the reference's `in_channel = out_channel` typo:
            # `in_channels` is intentionally NOT updated here.
        # TODO(synk): optional bf16 weight/activation casts for MXU-bound large
        # channel counts (v6e/v7x 256x256 MXU) — kept f32 for reference fidelity.

    def __call__(self, xyz, xyz_prev, features=None, features_prev=None):
        """xyz: (B,N,3), xyz_prev: (B,M,3)|None, features: (B,C1,N)|None,
        features_prev: (B,C2,M).  Returns (B, out_channels[-1], N)."""
        if xyz_prev is None:
            # TODO(synk): xyz_prev=None branch relies on features_prev.expand over a
            # torch.Size+list expression that errors in the reference; not ported.
            raise NotImplementedError("xyz_prev=None branch not supported")

        c_prev = features_prev.shape[1]
        c_cur = features.shape[1] if features is not None else 0

        # Layer 0: conv fused into the interpolation kernel (weight split along Cin).
        w0, gamma, beta = self.layers[0]
        assert w0.shape[1] == c_prev + c_cur, \
            "Conv1d in_channels mismatch (same failure mode as the PyTorch reference)"
        w0_prev = w0[:, :c_prev]
        w0_cur = w0[:, c_prev:] if c_cur > 0 else None

        y, stats = interpolate_conv0_stats(xyz, xyz_prev, features_prev,
                                           features, w0_prev, w0_cur)

        # Middle layers: each is ONE fused kernel (BN+ReLU of layer i, conv+stats
        # of layer i+1) -> one HBM read + one HBM write per layer.
        for (w_next, g_next, b_next) in self.layers[1:]:
            assert w_next.shape[1] == y.shape[1], \
                "Conv1d in_channels mismatch (same failure mode as the PyTorch reference)"
            y, stats_next = bn_relu_conv_stats(y, stats, gamma, beta, w_next)
            stats, gamma, beta = stats_next, g_next, b_next

        # Final layer: BN + ReLU only.
        return bn_relu_final(y, stats, gamma, beta)            # (B, Cout_last, N)


# ----------------------------------------------------------------------------
if __name__ == "__main__":
    key = jax.random.PRNGKey(0)
    k1, k2, k3, k4, kp = jax.random.split(key, 5)

    B, N, M = 2, 16, 8
    C_cur, C_prev = 4, 4          # in_channels1 + in_channels2 = 8

    xyz = jax.random.normal(k1, (B, N, 3), jnp.float32)
    xyz_prev = jax.random.normal(k2, (B, M, 3), jnp.float32)
    features = jax.random.normal(k3, (B, C_cur, N), jnp.float32)        # (B, C, N)
    features_prev = jax.random.normal(k4, (B, C_prev, M), jnp.float32)  # (B, C, M)

    # out_channels[0] == in1+in2 so the module's conv-channel typo still runs.
    model = PointNet2FeaturePropagator(C_prev, C_cur, [C_prev + C_cur, 32], key=kp)

    out = model(xyz, xyz_prev, features, features_prev)
    out = jax.block_until_ready(out)
    assert out.shape == (B, 32, N), out.shape
    assert bool(jnp.all(jnp.isfinite(out)))
    assert bool(jnp.all(out >= 0.0))  # ends in ReLU
    print("KERNEL_OK")
</pallas_src>

<mosaic_0001>
module attributes {stable_mosaic.version = 11 : i64} {
  func.func @kernel(%arg0: i32, %arg1: i32, %arg2: memref<1x3x16xf32, #tpu.memory_space<vmem>>, %arg3: memref<1x8x3xf32, #tpu.memory_space<vmem>>, %arg4: memref<1x4x8xf32, #tpu.memory_space<vmem>>, %arg5: memref<1x4x16xf32, #tpu.memory_space<vmem>>, %arg6: memref<8x4xf32, #tpu.memory_space<vmem>>, %arg7: memref<8x4xf32, #tpu.memory_space<vmem>>, %arg8: memref<1x8x16xf32, #tpu.memory_space<vmem>>, %arg9: memref<1x1x8x2xf32, #tpu.memory_space<vmem>>) attributes {dimension_semantics = [#tpu.dimension_semantics<parallel>, #tpu.dimension_semantics<parallel>], iteration_bounds = array<i64: 2, 1>, scalar_prefetch = 0 : i64, scratch_operands = 0 : i64, tpu.core_type = #tpu.core_type<tc>, window_params = [{transform_indices = @transform_0, window_bounds = array<i64: 1, 3, 16>}, {transform_indices = @transform_1, window_bounds = array<i64: 1, 8, 3>}, {transform_indices = @transform_2, window_bounds = array<i64: 1, 4, 8>}, {transform_indices = @transform_3, window_bounds = array<i64: 1, 4, 16>}, {pipeline_mode = #tpu.pipeline_mode<synchronous>, transform_indices = @transform_4, window_bounds = array<i64: 8, 4>}, {pipeline_mode = #tpu.pipeline_mode<synchronous>, transform_indices = @transform_5, window_bounds = array<i64: 8, 4>}, {transform_indices = @transform_6, window_bounds = array<i64: 1, 8, 16>}, {transform_indices = @transform_7, window_bounds = array<i64: 1, 1, 8, 2>}]} {
    %c0 = arith.constant 0 : index
    %c0_0 = arith.constant 0 : index
    %c0_1 = arith.constant 0 : index
    %0 = vector.load %arg2[%c0, %c0_0, %c0_1] : memref<1x3x16xf32, #tpu.memory_space<vmem>>, vector<1x3x16xf32>
    %1 = vector.shape_cast %0 : vector<1x3x16xf32> to vector<3x16xf32>
    %c0_2 = arith.constant 0 : index
    %c0_3 = arith.constant 0 : index
    %c0_4 = arith.constant 0 : index
    %2 = vector.load %arg3[%c0_2, %c0_3, %c0_4] : memref<1x8x3xf32, #tpu.memory_space<vmem>>, vector<1x8x3xf32>
    %3 = vector.shape_cast %2 : vector<1x8x3xf32> to vector<8x3xf32>
    %4 = vector.extract_strided_slice %3 {offsets = [0, 0], sizes = [8, 1], strides = [1, 1]} : vector<8x3xf32> to vector<8x1xf32>
    %5 = vector.extract_strided_slice %1 {offsets = [0, 0], sizes = [1, 16], strides = [1, 1]} : vector<3x16xf32> to vector<1x16xf32>
    %6 = vector.broadcast %4 : vector<8x1xf32> to vector<8x16xf32>
    %7 = vector.broadcast %5 : vector<1x16xf32> to vector<8x16xf32>
    %8 = arith.subf %6, %7 : vector<8x16xf32>
    %9 = arith.mulf %8, %8 : vector<8x16xf32>
    %10 = vector.extract_strided_slice %3 {offsets = [0, 1], sizes = [8, 1], strides = [1, 1]} : vector<8x3xf32> to vector<8x1xf32>
    %11 = vector.extract_strided_slice %1 {offsets = [1, 0], sizes = [1, 16], strides = [1, 1]} : vector<3x16xf32> to vector<1x16xf32>
    %12 = vector.broadcast %10 : vector<8x1xf32> to vector<8x16xf32>
    %13 = vector.broadcast %11 : vector<1x16xf32> to vector<8x16xf32>
    %14 = arith.subf %12, %13 : vector<8x16xf32>
    %15 = arith.mulf %14, %14 : vector<8x16xf32>
    %16 = arith.addf %9, %15 : vector<8x16xf32>
    %17 = vector.extract_strided_slice %3 {offsets = [0, 2], sizes = [8, 1], strides = [1, 1]} : vector<8x3xf32> to vector<8x1xf32>
    %18 = vector.extract_strided_slice %1 {offsets = [2, 0], sizes = [1, 16], strides = [1, 1]} : vector<3x16xf32> to vector<1x16xf32>
    %19 = vector.broadcast %17 : vector<8x1xf32> to vector<8x16xf32>
    %20 = vector.broadcast %18 : vector<1x16xf32> to vector<8x16xf32>
    %21 = arith.subf %19, %20 : vector<8x16xf32>
    %22 = arith.mulf %21, %21 : vector<8x16xf32>
    %23 = arith.addf %16, %22 : vector<8x16xf32>
    %24 = tpu.iota {dimensions = array<i32: 0>} : vector<8x16xi32>
    %cst = arith.constant 0.000000e+00 : f32
    %25 = vector.broadcast %cst : f32 to vector<8x16xf32>
    %cst_5 = arith.constant 0.000000e+00 : f32
    %26 = vector.broadcast %cst_5 : f32 to vector<1x16xf32>
    %cst_6 = arith.constant dense<0x7F800000> : vector<16xf32>
    %27 = vector.multi_reduction <minimumf>, %23, %cst_6 [0] : vector<8x16xf32> to vector<16xf32>
    %28 = vector.shape_cast %27 : vector<16xf32> to vector<1x16xf32>
    %29 = vector.broadcast %28 : vector<1x16xf32> to vector<8x16xf32>
    %30 = arith.cmpf ole, %23, %29 : vector<8x16xf32>
    %c8_i32 = arith.constant 8 : i32
    %31 = vector.broadcast %c8_i32 : i32 to vector<8x16xi32>
    %32 = arith.select %30, %24, %31 : vector<8x16xi1>, vector<8x16xi32>
    %cst_7 = arith.constant dense<2147483647> : vector<16xi32>
    %33 = vector.multi_reduction <minsi>, %32, %cst_7 [0] : vector<8x16xi32> to vector<16xi32>
    %34 = vector.shape_cast %33 : vector<16xi32> to vector<1x16xi32>
    %35 = vector.broadcast %34 : vector<1x16xi32> to vector<8x16xi32>
    %36 = arith.cmpi eq, %24, %35 : vector<8x16xi32>
    %cst_8 = arith.constant 0.000000e+00 : f32
    %37 = vector.broadcast %cst_8 : f32 to vector<1x16xf32>
    %38 = arith.maximumf %28, %37 : vector<1x16xf32>
    %39 = math.sqrt %38 : vector<1x16xf32>
    %cst_9 = arith.constant 9.99999993E-9 : f32
    %40 = vector.broadcast %cst_9 : f32 to vector<1x16xf32>
    %41 = arith.addf %39, %40 : vector<1x16xf32>
    %cst_10 = arith.constant 1.000000e+00 : f32
    %42 = vector.broadcast %cst_10 : f32 to vector<1x16xf32>
    %43 = arith.divf %42, %41 : vector<1x16xf32>
    %44 = arith.extui %36 : vector<8x16xi1> to vector<8x16xi32>
    %45 = arith.sitofp %44 : vector<8x16xi32> to vector<8x16xf32>
    %46 = vector.broadcast %43 : vector<1x16xf32> to vector<8x16xf32>
    %47 = arith.mulf %46, %45 : vector<8x16xf32>
    %48 = arith.addf %25, %47 : vector<8x16xf32>
    %49 = arith.addf %26, %43 : vector<1x16xf32>
    %cst_11 = arith.constant 1.000000e+30 : f32
    %50 = vector.broadcast %cst_11 : f32 to vector<8x16xf32>
    %51 = arith.select %36, %50, %23 : vector<8x16xi1>, vector<8x16xf32>
    %cst_12 = arith.constant dense<0x7F800000> : vector<16xf32>
    %52 = vector.multi_reduction <minimumf>, %51, %cst_12 [0] : vector<8x16xf32> to vector<16xf32>
    %53 = vector.shape_cast %52 : vector<16xf32> to vector<1x16xf32>
    %54 = vector.broadcast %53 : vector<1x16xf32> to vector<8x16xf32>
    %55 = arith.cmpf ole, %51, %54 : vector<8x16xf32>
    %c8_i32_13 = arith.constant 8 : i32
    %56 = vector.broadcast %c8_i32_13 : i32 to vector<8x16xi32>
    %57 = arith.select %55, %24, %56 : vector<8x16xi1>, vector<8x16xi32>
    %cst_14 = arith.constant dense<2147483647> : vector<16xi32>
    %58 = vector.multi_reduction <minsi>, %57, %cst_14 [0] : vector<8x16xi32> to vector<16xi32>
    %59 = vector.shape_cast %58 : vector<16xi32> to vector<1x16xi32>
    %60 = vector.broadcast %59 : vector<1x16xi32> to vector<8x16xi32>
    %61 = arith.cmpi eq, %24, %60 : vector<8x16xi32>
    %cst_15 = arith.constant 0.000000e+00 : f32
    %62 = vector.broadcast %cst_15 : f32 to vector<1x16xf32>
    %63 = arith.maximumf %53, %62 : vector<1x16xf32>
    %64 = math.sqrt %63 : vector<1x16xf32>
    %cst_16 = arith.constant 9.99999993E-9 : f32
    %65 = vector.broadcast %cst_16 : f32 to vector<1x16xf32>
    %66 = arith.addf %64, %65 : vector<1x16xf32>
    %cst_17 = arith.constant 1.000000e+00 : f32
    %67 = vector.broadcast %cst_17 : f32 to vector<1x16xf32>
    %68 = arith.divf %67, %66 : vector<1x16xf32>
    %69 = arith.extui %61 : vector<8x16xi1> to vector<8x16xi32>
    %70 = arith.sitofp %69 : vector<8x16xi32> to vector<8x16xf32>
    %71 = vector.broadcast %68 : vector<1x16xf32> to vector<8x16xf32>
    %72 = arith.mulf %71, %70 : vector<8x16xf32>
    %73 = arith.addf %48, %72 : vector<8x16xf32>
    %74 = arith.addf %49, %68 : vector<1x16xf32>
    %cst_18 = arith.constant 1.000000e+30 : f32
    %75 = vector.broadcast %cst_18 : f32 to vector<8x16xf32>
    %76 = arith.select %61, %75, %51 : vector<8x16xi1>, vector<8x16xf32>
    %cst_19 = arith.constant dense<0x7F800000> : vector<16xf32>
    %77 = vector.multi_reduction <minimumf>, %76, %cst_19 [0] : vector<8x16xf32> to vector<16xf32>
    %78 = vector.shape_cast %77 : vector<16xf32> to vector<1x16xf32>
    %79 = vector.broadcast %78 : vector<1x16xf32> to vector<8x16xf32>
    %80 = arith.cmpf ole, %76, %79 : vector<8x16xf32>
    %c8_i32_20 = arith.constant 8 : i32
    %81 = vector.broadcast %c8_i32_20 : i32 to vector<8x16xi32>
    %82 = arith.select %80, %24, %81 : vector<8x16xi1>, vector<8x16xi32>
    %cst_21 = arith.constant dense<2147483647> : vector<16xi32>
    %83 = vector.multi_reduction <minsi>, %82, %cst_21 [0] : vector<8x16xi32> to vector<16xi32>
    %84 = vector.shape_cast %83 : vector<16xi32> to vector<1x16xi32>
    %85 = vector.broadcast %84 : vector<1x16xi32> to vector<8x16xi32>
    %86 = arith.cmpi eq, %24, %85 : vector<8x16xi32>
    %cst_22 = arith.constant 0.000000e+00 : f32
    %87 = vector.broadcast %cst_22 : f32 to vector<1x16xf32>
    %88 = arith.maximumf %78, %87 : vector<1x16xf32>
    %89 = math.sqrt %88 : vector<1x16xf32>
    %cst_23 = arith.constant 9.99999993E-9 : f32
    %90 = vector.broadcast %cst_23 : f32 to vector<1x16xf32>
    %91 = arith.addf %89, %90 : vector<1x16xf32>
    %cst_24 = arith.constant 1.000000e+00 : f32
    %92 = vector.broadcast %cst_24 : f32 to vector<1x16xf32>
    %93 = arith.divf %92, %91 : vector<1x16xf32>
    %94 = arith.extui %86 : vector<8x16xi1> to vector<8x16xi32>
    %95 = arith.sitofp %94 : vector<8x16xi32> to vector<8x16xf32>
    %96 = vector.broadcast %93 : vector<1x16xf32> to vector<8x16xf32>
    %97 = arith.mulf %96, %95 : vector<8x16xf32>
    %98 = arith.addf %73, %97 : vector<8x16xf32>
    %99 = arith.addf %74, %93 : vector<1x16xf32>
    %cst_25 = arith.constant 1.000000e+00 : f32
    %100 = vector.broadcast %cst_25 : f32 to vector<1x16xf32>
    %101 = arith.divf %100, %99 : vector<1x16xf32>
    %102 = vector.broadcast %101 : vector<1x16xf32> to vector<8x16xf32>
    %103 = arith.mulf %98, %102 : vector<8x16xf32>
    %c0_26 = arith.constant 0 : index
    %c0_27 = arith.constant 0 : index
    %c0_28 = arith.constant 0 : index
    %104 = vector.load %arg4[%c0_26, %c0_27, %c0_28] : memref<1x4x8xf32, #tpu.memory_space<vmem>>, vector<1x4x8xf32>
    %105 = vector.shape_cast %104 : vector<1x4x8xf32> to vector<4x8xf32>
    %cst_29 = arith.constant dense<0.000000e+00> : vector<4x16xf32>
    %106 = tpu.matmul %105, %103, %cst_29 {dimension_numbers = #tpu.dot_dimension_numbers<[1], [0], [0], [1], [0, 0, 1, 1], [], []>} : vector<4x8xf32>, vector<8x16xf32>, vector<4x16xf32> -> vector<4x16xf32>
    %c0_30 = arith.constant 0 : index
    %c0_31 = arith.constant 0 : index
    %107 = vector.load %arg6[%c0_30, %c0_31] : memref<8x4xf32, #tpu.memory_space<vmem>>, vector<8x4xf32>
    %cst_32 = arith.constant dense<0.000000e+00> : vector<8x16xf32>
    %108 = tpu.matmul %107, %106, %cst_32 {dimension_numbers = #tpu.dot_dimension_numbers<[1], [0], [0], [1], [0, 0, 1, 1], [], []>} : vector<8x4xf32>, vector<4x16xf32>, vector<8x16xf32> -> vector<8x16xf32>
    %c0_33 = arith.constant 0 : index
    %c0_34 = arith.constant 0 : index
    %c0_35 = arith.constant 0 : index
    %109 = vector.load %arg5[%c0_33, %c0_34, %c0_35] : memref<1x4x16xf32, #tpu.memory_space<vmem>>, vector<1x4x16xf32>
    %110 = vector.shape_cast %109 : vector<1x4x16xf32> to vector<4x16xf32>
    %c0_36 = arith.constant 0 : index
    %c0_37 = arith.constant 0 : index
    %111 = vector.load %arg7[%c0_36, %c0_37] : memref<8x4xf32, #tpu.memory_space<vmem>>, vector<8x4xf32>
    %cst_38 = arith.constant dense<0.000000e+00> : vector<8x16xf32>
    %112 = tpu.matmul %111, %110, %cst_38 {dimension_numbers = #tpu.dot_dimension_numbers<[1], [0], [0], [1], [0, 0, 1, 1], [], []>} : vector<8x4xf32>, vector<4x16xf32>, vector<8x16xf32> -> vector<8x16xf32>
    %113 = arith.addf %108, %112 : vector<8x16xf32>
    %c0_39 = arith.constant 0 : index
    %c0_40 = arith.constant 0 : index
    %c0_41 = arith.constant 0 : index
    %114 = vector.load %arg8[%c0_39, %c0_40, %c0_41] : memref<1x8x16xf32, #tpu.memory_space<vmem>>, vector<1x8x16xf32>
    %115 = vector.shape_cast %114 : vector<1x8x16xf32> to vector<8x16xf32>
    %116 = vector.shape_cast %113 : vector<8x16xf32> to vector<1x8x16xf32>
    tpu.vector_store %arg8[%c0_39, %c0_40, %c0_41], %116 {strides = array<i32>} : memref<1x8x16xf32, #tpu.memory_space<vmem>>, vector<1x8x16xf32>,
    %cst_42 = arith.constant dense<0.000000e+00> : vector<8xf32>
    %117 = vector.multi_reduction <add>, %113, %cst_42 [1] : vector<8x16xf32> to vector<8xf32>
    %118 = vector.shape_cast %117 : vector<8xf32> to vector<8x1xf32>
    %119 = arith.mulf %113, %113 : vector<8x16xf32>
    %cst_43 = arith.constant dense<0.000000e+00> : vector<8xf32>
    %120 = vector.multi_reduction <add>, %119, %cst_43 [1] : vector<8x16xf32> to vector<8xf32>
    %121 = vector.shape_cast %120 : vector<8xf32> to vector<8x1xf32>
    %122 = tpu.concatenate %118, %121 in 1 : vector<8x1xf32>, vector<8x1xf32> -> vector<8x2xf32>
    %c0_44 = arith.constant 0 : index
    %c0_45 = arith.constant 0 : index
    %c0_46 = arith.constant 0 : index
    %c0_47 = arith.constant 0 : index
    %123 = vector.load %arg9[%c0_44, %c0_45, %c0_46, %c0_47] : memref<1x1x8x2xf32, #tpu.memory_space<vmem>>, vector<1x1x8x2xf32>
    %124 = vector.shape_cast %123 : vector<1x1x8x2xf32> to vector<8x2xf32>
    %125 = vector.shape_cast %122 : vector<8x2xf32> to vector<1x1x8x2xf32>
    tpu.vector_store %arg9[%c0_44, %c0_45, %c0_46, %c0_47], %125 {strides = array<i32>} : memref<1x1x8x2xf32, #tpu.memory_space<vmem>>, vector<1x1x8x2xf32>,
    return
  }
  func.func @transform_0(%arg0: i32, %arg1: i32) -> (i32, i32, i32) {
    %c0_i32 = arith.constant 0 : i32
    %c0_i32_0 = arith.constant 0 : i32
    return %arg0, %c0_i32, %arg1 : i32, i32, i32
  }
  func.func @transform_1(%arg0: i32, %arg1: i32) -> (i32, i32, i32) {
    %c0_i32 = arith.constant 0 : i32
    %c0_i32_0 = arith.constant 0 : i32
    %c0_i32_1 = arith.constant 0 : i32
    return %arg0, %c0_i32, %c0_i32_0 : i32, i32, i32
  }
  func.func @transform_2(%arg0: i32, %arg1: i32) -> (i32, i32, i32) {
    %c0_i32 = arith.constant 0 : i32
    %c0_i32_0 = arith.constant 0 : i32
    %c0_i32_1 = arith.constant 0 : i32
    return %arg0, %c0_i32, %c0_i32_0 : i32, i32, i32
  }
  func.func @transform_3(%arg0: i32, %arg1: i32) -> (i32, i32, i32) {
    %c0_i32 = arith.constant 0 : i32
    %c0_i32_0 = arith.constant 0 : i32
    return %arg0, %c0_i32, %arg1 : i32, i32, i32
  }
  func.func @transform_4(%arg0: i32, %arg1: i32) -> (i32, i32) {
    %c0_i32 = arith.constant 0 : i32
    %c0_i32_0 = arith.constant 0 : i32
    %c0_i32_1 = arith.constant 0 : i32
    return %c0_i32, %c0_i32_0 : i32, i32
  }
  func.func @transform_5(%arg0: i32, %arg1: i32) -> (i32, i32) {
    %c0_i32 = arith.constant 0 : i32
    %c0_i32_0 = arith.constant 0 : i32
    %c0_i32_1 = arith.constant 0 : i32
    return %c0_i32, %c0_i32_0 : i32, i32
  }
  func.func @transform_6(%arg0: i32, %arg1: i32) -> (i32, i32, i32) {
    %c0_i32 = arith.constant 0 : i32
    %c0_i32_0 = arith.constant 0 : i32
    return %arg0, %c0_i32, %arg1 : i32, i32, i32
  }
  func.func @transform_7(%arg0: i32, %arg1: i32) -> (i32, i32, i32, i32) {
    %c0_i32 = arith.constant 0 : i32
    %c0_i32_0 = arith.constant 0 : i32
    %c0_i32_1 = arith.constant 0 : i32
    return %arg0, %arg1, %c0_i32, %c0_i32_0 : i32, i32, i32, i32
  }
}

</mosaic_0001>

<bundles_post_ra>
// kernel: tpu_custom_call.1
= control target key start
LH: loop header
LB: loop body
LE: loop exit
PB: predicated region body
PF: predicated region fallthrough
CT: control target
= control target key end

     0   :  { %13 = vsyncpa [#allocation3], 0  ;;  %s1233_s0 = inlined_call_operand.vmem [shape: f32[2,3,16], index: 0, kind: input, shape index: {}]   ;;  %s1234_s1 = inlined_call_operand.vmem [shape: f32[2,8,3], index: 1, kind: input, shape index: {}]   ;;  %s1235_s2 = inlined_call_operand.vmem [shape: f32[2,4,8], index: 2, kind: input, shape index: {}]   ;;  %s1236_s3 = inlined_call_operand.vmem [shape: f32[2,4,16], index: 3, kind: input, shape index: {}]   ;;  %s1237_s4 = inlined_call_operand.vmem [shape: f32[8,4], index: 4, kind: input, shape index: {}]   ;;  %s1238_s5 = inlined_call_operand.vmem [shape: f32[8,4], index: 5, kind: input, shape index: {}]   ;;  %s1239_s6 = inlined_call_operand.hbm [shape: f32[2,8,16], index: 6, kind: output, shape index: {0}]   ;;  %s1240_s7 = inlined_call_operand.vmem [shape: f32[2,1,8,2], index: 7, kind: output, shape index: {1}]  }
   0x1   :  { %15 = vsyncpa [#allocation3 + $0x1], 0  ;;  %s1075_s24 = smov 0   ;;  %s1077_s25 = smov 0  }
   0x2   :  { %s1079_s26 = smov 0   ;;  %s1081_s27 = smov 0  }
   0x3   :  { %s1083_s28 = smov 0   ;;  %s1085_s29 = smov 0  }
   0x4 LB: > { %s851_s30 = sadd.s32 4294967295, %s1029_s29   ;;  %s852_s8 = sadd.s32 4294967294, %s1029_s29   ;;  %s1029_s29 = sphi %s1085_s29, %s21_s29   ;;  %s1025_s28 = sphi %s1083_s28, %s1247_s28   ;;  %s1021_s27 = sphi %s1081_s27, %s1246_s27   ;;  %s1017_s26 = sphi %s1079_s26, %s1245_s26   ;;  %s1013_s25 = sphi %s1077_s25, %s1244_s25   ;;  %s1009_s24 = sphi %s1075_s24, %s1243_s24  }
   0x5   : > { %s33_s9 = sadd.s32 1, %s1025_s28  ;;  %s192_s10 = sadd.s32 1, %s1017_s26 }
   0x6   : > { %p35_p0 = scmp.ge.s32.totalorder %s33_s9, 2  ;;  %p202_p1 = scmp.ne.s32.totalorder %s1017_s26, %s1013_s25 }
   0x7   : > { %p203_p2 = scmp.eq.s32.totalorder %s851_s30, 1  ;;  %p208_p3 = scmp.ne.s32.totalorder %s1013_s25, %s1009_s24 }
   0x8   : > { %s1249_s9 = smov (%p35_p0, %s33_s9), 0  ;;  %p209_p5 = scmp.eq.s32.totalorder %s852_s8, 1 }
   0x9   : > { %p1115_p4 = por %p203_p2, %p202_p1  ;;  %s187_s12 = ssub.s32 %s1025_s28, %s1249_s9 }
   0xa   : > { %p855_p6 = scmp.ge.s32.totalorder %s1029_s29, 1  ;;  %p190_p7 = scmp.eq.s32.totalorder %s187_s12, 0 }
   0xb   : > { %p1122_p8 = por %p209_p5, %p208_p3  ;;  %p295_p9 = scmp.lt.s32.totalorder %s1029_s29, 3 }
   0xc   : > { %s1128_s14 = scalar_select %p190_p7, %s1017_s26, %s192_s10  }
   0xd   : > { %p296_p10 = pnand %p855_p6, %p295_p9 }
   0xe   : > { %p351_p11 = scmp.lt.s32.totalorder (!%p296_p10), %s1021_s27, 1  ;;  %s339_s30 = sand.u32 (!%p296_p10), 1, %s1013_s25  }
   0xf   : > { %299 = sbr.rel (%p296_p10) target bundleno = 677 (0x2a5), region = 44  ;;  %s871_s8 = sshll.u32 (!%p296_p10), %s1021_s27, 3 }
  0x10   : > { %s702_s17 = scalar_lea.hbm (!%p296_p10), %s1239_s6, %s871_s8 }
  0x11   : > { %s706_s21 = sshll.u32 (!%p296_p10), %s702_s17, 4  ;;  %s707_s21 = int_to_ptr.hbm [resolvable:$true] %s706_s21 }
  0x12   : > { %s965_s22 = sshra.s32 (!%p296_p10), %s707_s21, 4  ;;  %s966_s22 = int_to_ptr.hbm [resolvable:$true] %s965_s22 }
  0x13   : > { %p972_p1 = scmp.lt.s32.totalorder (!%p296_p10), %s966_s22, %s1239_s6 }
  0x14   : > { %v1031_v0 = vmov 0   ;;  %v1032_v1 = vmov 2   ;;  %s1132_s15 = scalar_select %p351_p11, %s1021_s27, 1  ;;  %v1033_v3 = vmov 1   ;;  %vm408_vm0 = vcmask 130048  }
  0x15   : > { %933 = vset.pattern.permute.xlu0 %v1031_v0  ;;  %935 = vset.pattern.permute.xlu1 %v1032_v1  ;;  %v406_v23 = vlaneseq  ;;  %s684_s27 = scalar_lea.sflag [#allocation3], %s339_s30 }
  0x16   : > { %s858_s16 = sshll.u32 %s1132_s15, 3  ;;  %s1141_s20 = sshll.u32 %s1132_s15, 2 }
  0x17   : > { %s361_s19 = scalar_lea.vmem %s1234_s1, %s858_s16  ;;  %s357_s23 = scalar_lea.vmem %s1233_s0, %s1141_s20  ;;  %v1148_v26 = vshrl.u32 %v406_v23, 7 }
  0x18   : > { %v381_v2 = vld [vmem:[%s361_s19] sm:$0xff]  ;;  %s365_s10 = scalar_lea.vmem %s1235_s2, %s1141_s20  ;;  %s372_s18 = scalar_lea.vmem %s1236_s3, %s1141_s20 }
  0x19   : > { %384 = vperm.xlu0 %933, %v381_v2   ;;  %399 = vperm.xlu1 %935, %v381_v2   ;;  %v380_v5 = vld [vmem:[%s357_s23] sm:$0x7]  ;;  %s967_s23 = scalar_lea.hbm %s966_s22, 8  ;;  %s971_s20 = scalar_lea.hbm %s1239_s6, 16 }
  0x1a   : > { %v387_v6 = vperm.slane %v380_v5, 0  ;;  %v402_v7 = vperm.slane %v380_v5, 2  ;;  %v394_v9 = vperm.slane %v380_v5, 1  ;;  %p968_p12 = scmp.ne.s32.totalorder %s966_s22, %s967_s23  ;;  %p973_p2 = scmp.lt.s32.totalorder %s971_s20, %s967_s23 }
  0x1c   : > { %p969_p13 = pnand %p968_p12, %p1115_p4  ;;  %p974_p3 = por %p973_p2, %p972_p1 }
  0x1e   : > { %p970_p0 = pneg %p969_p13 }
  0x20   : > { %p975_p5 = pnand %p974_p3, %p970_p0 }
  0x21   : > { %934 = vset.pattern.permute.xlu0 %v1033_v3 }
  0x22   : > { %391 = vperm.xlu0 %934, %v381_v2  }
  0x2a   : > { %936 = vset.pattern.permute.xlu0 %v1032_v1 }
  0x8b   : > { %v385_v4 = vpop.permute.xlu0 %384  ;;  %v400_v8 = vpop.permute.xlu1 %399 }
  0x8c   : > { %v388_v10 = vsub.f32 %v385_v4, %v387_v6  ;;  %v403_v11 = vsub.f32 %v400_v8, %v402_v7 }
  0x8e   : > { %v389_v14 = vmul.f32 %v388_v10, %v388_v10  ;;  %v404_v16 = vmul.f32 %v403_v11, %v403_v11 }
  0x94   : > { %v392_v12 = vpop.permute.xlu0 %391 }
  0x95   : > { %v395_v13 = vsub.f32 %v392_v12, %v394_v9 }
  0x97   : > { %v396_v15 = vmul.f32 %v395_v13, %v395_v13 }
  0x99   : > { %v397_v17 = vadd.f32 %v396_v15, %v389_v14 }
  0x9b   : > { %v405_v18 = vadd.f32 %v404_v16, %v397_v17 }
  0x9d   : > { %v409_v19 = vsel %vm408_vm0, %v405_v18, inf }
  0x9e   : > { %v410_v20 = vrot.slane %v409_v19, 4 }
  0xa0   : > { %v411_v21 = vmin.f32 %v409_v19, %v410_v20 }
  0xa2   : > { %v412_v22 = vrot.slane %v411_v21, 2 }
  0xa4   : > { %v413_v24 = vmin.f32 %v411_v21, %v412_v22 }
  0xa6   : > { %v414_v25 = vrot.slane %v413_v24, 1 }
  0xa8   : > { %v415_v27 = vmin.f32 %v413_v24, %v414_v25 }
  0xaa   : > { %vm416_vm1 = vcmp.le.f32.partialorder %v405_v18, %v415_v27  ;;  %v429_v28 = vmax.f32 %v415_v27, 0.0 }
  0xab   : > { %v417_v29 = vsel %vm416_vm1, %v1148_v26, 8 }
  0xac   : > { %v418_v30 = vsel %vm408_vm0, %v417_v29, 2147483647  ;;  %937 = vrsqrt.f32 %v429_v28  ;;  %vm437_vm7 = vcmp.eq.f32.partialorder %v429_v28, inf  ;;  %v440_v56 = vand.u32 2147483648, %v429_v28 }
  0xad   : > { %v419_v31 = vrot.slane %v418_v30, 4  ;;  %vm439_vm8 = vcmp.eq.f32.partialorder %v429_v28, 0.0 }
  0xaf   : > { %vm420_vm2 = vcmp.lt.s32.totalorder %v418_v30, %v419_v31 }
  0xb0   : > { %v421_v32 = vsel %vm420_vm2, %v418_v30, %v419_v31 }
  0xb1   : > { %v422_v33 = vrot.slane %v421_v32, 2 }
  0xb2   : > { %v938_v34 = vpop.eup %937 }
  0xb3   : > { %vm423_vm3 = vcmp.lt.s32.totalorder %v421_v32, %v422_v33  ;;  %v431_v35 = vmul.f32 %v938_v34, %v429_v28 }
  0xb4   : > { %v424_v36 = vsel %vm423_vm3, %v421_v32, %v422_v33 }
  0xb5   : > { %v425_v37 = vrot.slane %v424_v36, 1  ;;  %v432_v38 = vmul.f32 %v938_v34, %v431_v35 }
  0xb7   : > { %vm426_vm4 = vcmp.lt.s32.totalorder %v424_v36, %v425_v37  ;;  %v433_v40 = vmul.f32 0.5, %v432_v38 }
  0xb8   : > { %v1152_v39 = vsel %vm426_vm4, %v424_v36, %v425_v37 }
  0xb9   : > { %vm428_vm5 = vcmp.eq.s32.totalorder %v1148_v26, %v1152_v39  ;;  %v434_v44 = vsub.f32 1.5, %v433_v40 }
  0xba   : > { %v463_v41 = vsel %vm428_vm5, 1e+30, %v405_v18 }
  0xbb   : > { %v464_v42 = vsel %vm408_vm0, %v463_v41, inf  ;;  %v435_v47 = vmul.f32 %v938_v34, %v434_v44  ;;  %v1034_v44 = vmov 0.0  }
  0xbc   : > { %v465_v43 = vrot.slane %v464_v42, 4 }
  0xbd   : > { %v436_v50 = vmul.f32 %v435_v47, %v429_v28 }
  0xbe   : > { %v466_v45 = vmin.f32 %v464_v42, %v465_v43 }
  0xbf   : > { %v438_v54 = vsel %vm437_vm7, %v429_v28, %v436_v50 }
  0xc0   : > { %v467_v46 = vrot.slane %v466_v45, 2  ;;  %v441_v58 = vsel %vm439_vm8, %v440_v56, %v438_v54 }
  0xc1   : > { %v442_v60 = vadd.f32 1e-08, %v441_v58 }
  0xc2   : > { %v468_v48 = vmin.f32 %v466_v45, %v467_v46  ;;  %v862_v45 = vsel %vm428_vm5, 1.0, %v1034_v44 }
  0xc3   : > { %v454_v29 = vand.u32 2147483648, %v442_v60  ;;  %vm448_vm1 = vweird.f32 %v442_v60  ;;  %v452_v30 = vand.u32 2147483647, %v442_v60 }
  0xc4   : > { %v469_v49 = vrot.slane %v468_v48, 1 }
  0xc5   : > { %v455_v36 = vor.u32 1.1754944e-38, %v454_v29  ;;  %vm453_vm4 = vcmp.eq.f32.partialorder %v452_v30, 8.507059e+37  ;;  %v589_v29 = vld [vmem:[%s365_s10] sm:$0xf]  ;;  %s856_s10 = sshll.u32 %s339_s30, 3 }
  0xc6   : > { %v470_v51 = vmin.f32 %v468_v48, %v469_v49  ;;  %v615_v30 = vld [vmem:[%s372_s18] sm:$0xf]  ;;  %s341_s18 = scalar_lea.vmem [#allocation2], %s856_s10 }
  0xc7   : > { %s704_s19 = sshll.u32 %s341_s18, 4  ;;  %s705_s19 = int_to_ptr.vmem [resolvable:$true] %s704_s19 }
  0xc8   : > { %vm471_vm6 = vcmp.le.f32.partialorder %v463_v41, %v470_v51  ;;  %v484_v52 = vmax.f32 %v470_v51, 0.0 }
  0xc9   : > { %v472_v53 = vsel %vm471_vm6, %v1148_v26, 8 }
  0xca   : > { %v473_v55 = vsel %vm408_vm0, %v472_v53, 2147483647  ;;  %939 = vrsqrt.f32 %v484_v52  ;;  %vm492_vm13 = vcmp.eq.f32.partialorder %v484_v52, inf  ;;  %v495_v13 = vand.u32 2147483648, %v484_v52 }
  0xcb   : > { %v474_v57 = vrot.slane %v473_v55, 4  ;;  %941 = vrcp.f32 %v442_v60  ;;  %vm494_vm14 = vcmp.eq.f32.partialorder %v484_v52, 0.0 }
  0xcd   : > { %vm475_vm9 = vcmp.lt.s32.totalorder %v473_v55, %v474_v57 }
  0xce   : > { %v476_v59 = vsel %vm475_vm9, %v473_v55, %v474_v57 }
  0xcf   : > { %v477_v61 = vrot.slane %v476_v59, 2 }
  0xd0   : > { %v940_v62 = vpop.eup %939 }
  0xd1   : > { %vm478_vm10 = vcmp.lt.s32.totalorder %v476_v59, %v477_v61  ;;  %v486_v63 = vmul.f32 %v940_v62, %v484_v52  ;;  %v942_v7 = vpop.eup %941 }
  0xd2   : > { %v479_v0 = vsel %vm478_vm10, %v476_v59, %v477_v61  ;;  %v444_v12 = vmul.f32 %v942_v7, %v442_v60  ;;  %vm449_vm15 = vweird.f32 %v942_v7 }
  0xd3   : > { %v480_v1 = vrot.slane %v479_v0, 1  ;;  %v487_v2 = vmul.f32 %v940_v62, %v486_v63  ;;  %vm450_vm2 = vmor %vm448_vm1, %vm449_vm15 }
  0xd4   : > { %v445_v19 = vsub.f32 1.0, %v444_v12 }
  0xd5   : > { %vm481_vm11 = vcmp.lt.s32.totalorder %v479_v0, %v480_v1  ;;  %v488_v3 = vmul.f32 0.5, %v487_v2 }
  0xd6   : > { %v482_v4 = vsel %vm481_vm11, %v479_v0, %v480_v1  ;;  %v446_v22 = vmul.f32 %v942_v7, %v445_v19 }
  0xd7   : > { %vm483_vm12 = vcmp.eq.s32.totalorder %v1148_v26, %v482_v4  ;;  %v489_v5 = vsub.f32 1.5, %v488_v3 }
  0xd8   : > { %v518_v6 = vsel %vm483_vm12, 1e+30, %v463_v41  ;;  %v447_v27 = vadd.f32 %v942_v7, %v446_v22  ;;  %v863_v47 = vsel %vm483_vm12, 1.0, %v1034_v44 }
  0xd9   : > { %v490_v8 = vmul.f32 %v940_v62, %v489_v5  ;;  %v519_v9 = vsel %vm408_vm0, %v518_v6, inf }
  0xda   : > { %v520_v10 = vrot.slane %v519_v9, 4  ;;  %v451_v33 = vsel %vm450_vm2, %v942_v7, %v447_v27 }
  0xdb   : > { %v491_v11 = vmul.f32 %v490_v8, %v484_v52  ;;  %v456_v40 = vsel %vm453_vm4, %v455_v36, %v451_v33 }
  0xdc   : > { %v521_v14 = vmin.f32 %v519_v9, %v520_v10  ;;  %v460_v49 = vmul.f32 %v862_v45, %v456_v40 }
  0xdd   : > { %v493_v15 = vsel %vm492_vm13, %v484_v52, %v491_v11 }
  0xde   : > { %v496_v16 = vsel %vm494_vm14, %v495_v13, %v493_v15  ;;  %v522_v17 = vrot.slane %v521_v14, 2 }
  0xdf   : > { %v497_v18 = vadd.f32 1e-08, %v496_v16 }
  0xe0   : > { %v523_v20 = vmin.f32 %v521_v14, %v522_v17 }
  0xe1   : > { %943 = vrcp.f32 %v497_v18  ;;  %v509_v32 = vand.u32 2147483648, %v497_v18  ;;  %v507_v35 = vand.u32 2147483647, %v497_v18  ;;  %vm503_vm6 = vweird.f32 %v497_v18 }
  0xe2   : > { %v524_v21 = vrot.slane %v523_v20, 1 }
  0xe3   : > { %v510_v41 = vor.u32 1.1754944e-38, %v509_v32  ;;  %vm508_vm8 = vcmp.eq.f32.partialorder %v507_v35, 8.507059e+37  ;;  %v614_v32 = vld [vmem:[%s1237_s4] sm:$0xff] }
  0xe4   : > { %v525_v23 = vmin.f32 %v523_v20, %v524_v21 }
  0xe6   : > { %v539_v24 = vmax.f32 %v525_v23, 0.0  ;;  %vm526_vm9 = vcmp.le.f32.partialorder %v518_v6, %v525_v23 }
  0xe7   : > { %v944_v25 = vpop.eup %943  ;;  %v527_v53 = vsel %vm526_vm9, %v1148_v26, 8  ;;  %vm590_vm9 = vcmask 64512  }
  0xe8   : > { %v499_v28 = vmul.f32 %v944_v25, %v497_v18  ;;  %945 = vrsqrt.f32 %v539_v24  ;;  %vm504_vm3 = vweird.f32 %v944_v25  ;;  %v528_v56 = vsel %vm408_vm0, %v527_v53, 2147483647 }
  0xe9   : > { %vm505_vm7 = vmor %vm503_vm6, %vm504_vm3  ;;  %vm547_vm10 = vcmp.eq.f32.partialorder %v539_v24, inf  ;;  %v550_v39 = vand.u32 2147483648, %v539_v24  ;;  %v529_v58 = vrot.slane %v528_v56, 4  ;;  %vm549_vm5 = vcmp.eq.f32.partialorder %v539_v24, 0.0 }
  0xea   : > { %v500_v31 = vsub.f32 1.0, %v499_v28 }
  0xeb   : > { %vm530_vm11 = vcmp.lt.s32.totalorder %v528_v56, %v529_v58 }
  0xec   : > { %v501_v34 = vmul.f32 %v944_v25, %v500_v31  ;;  %v531_v62 = vsel %vm530_vm11, %v528_v56, %v529_v58  ;;  %v616_v31 = vld [vmem:[%s1238_s5] sm:$0xff] }
  0xed   : > { %v532_v0 = vrot.slane %v531_v62, 2 }
  0xee   : > { %v946_v37 = vpop.eup %945  ;;  %v502_v38 = vadd.f32 %v944_v25, %v501_v34 }
  0xef   : > { %v541_v42 = vmul.f32 %v946_v37, %v539_v24  ;;  %vm533_vm12 = vcmp.lt.s32.totalorder %v531_v62, %v532_v0 }
  0xf0   : > { %v506_v43 = vsel %vm505_vm7, %v944_v25, %v502_v38  ;;  %v534_v6 = vsel %vm533_vm12, %v531_v62, %v532_v0 }
  0xf1   : > { %v511_v46 = vsel %vm508_vm8, %v510_v41, %v506_v43  ;;  %v542_v48 = vmul.f32 %v946_v37, %v541_v42  ;;  %v535_v11 = vrot.slane %v534_v6, 1 }
  0xf2   : > { %v515_v50 = vmul.f32 %v863_v47, %v511_v46  ;;  %v517_v9 = vadd.f32 %v511_v46, %v456_v40 }
  0xf3   : > { %v543_v51 = vmul.f32 0.5, %v542_v48  ;;  %vm536_vm2 = vcmp.lt.s32.totalorder %v534_v6, %v535_v11 }
  0xf4   : > { %v516_v52 = vadd.f32 %v515_v50, %v460_v49  ;;  %v537_v14 = vsel %vm536_vm2, %v534_v6, %v535_v11 }
  0xf5   : > { %v544_v54 = vsub.f32 1.5, %v543_v51  ;;  %vm538_vm3 = vcmp.eq.s32.totalorder %v1148_v26, %v537_v14 }
  0xf6   : > { %v864_v18 = vsel %vm538_vm3, 1.0, %v1034_v44 }
  0xf7   : > { %v545_v55 = vmul.f32 %v946_v37, %v544_v54 }
  0xf9   : > { %v546_v57 = vmul.f32 %v545_v55, %v539_v24 }
  0xfb   : > { %v548_v59 = vsel %vm547_vm10, %v539_v24, %v546_v57  ;;  %vm621_vm10 = vcmask 1043456  }
  0xfc   : > { %v551_v60 = vsel %vm549_vm5, %v550_v39, %v548_v59  ;;  %vm617_vm5 = vcmask 31744   ;;  %866 = vmatpush.msk.msra.mxu1 %vm621_vm10, %v615_v30 }
  0xfd   : > { %v552_v61 = vadd.f32 1e-08, %v551_v60  ;;  %867 = vmatmul.msk.f32.vlgmr.msra.gmra.mxu1 %vm617_vm5, %v616_v31 }
  0xff   : > { %947 = vrcp.f32 %v552_v61  ;;  %v564_v3 = vand.u32 2147483648, %v552_v61  ;;  %v562_v5 = vand.u32 2147483647, %v552_v61  ;;  %vm558_vm14 = vweird.f32 %v552_v61 }
 0x101   : > { %v565_v8 = vor.u32 1.1754944e-38, %v564_v3  ;;  %vm563_vm1 = vcmp.eq.f32.partialorder %v562_v5, 8.507059e+37 }
 0x105   : > { %v948_v63 = vpop.eup %947 }
 0x106   : > { %v554_v1 = vmul.f32 %v948_v63, %v552_v61  ;;  %vm559_vm13 = vweird.f32 %v948_v63 }
 0x107   : > { %vm560_vm15 = vmor %vm558_vm14, %vm559_vm13 }
 0x108   : > { %v555_v2 = vsub.f32 1.0, %v554_v1 }
 0x10a   : > { %v556_v4 = vmul.f32 %v948_v63, %v555_v2 }
 0x10c   : > { %v557_v7 = vadd.f32 %v948_v63, %v556_v4 }
 0x10e   : > { %v561_v10 = vsel %vm560_vm15, %v948_v63, %v557_v7 }
 0x10f   : > { %v566_v12 = vsel %vm563_vm1, %v565_v8, %v561_v10 }
 0x110   : > { %v572_v13 = vadd.f32 %v566_v12, %v517_v9  ;;  %v570_v20 = vmul.f32 %v864_v18, %v566_v12 }
 0x112   : > { %949 = vrcp.f32 %v572_v13  ;;  %v584_v19 = vand.u32 2147483648, %v572_v13  ;;  %v582_v22 = vand.u32 2147483647, %v572_v13  ;;  %vm578_vm6 = vweird.f32 %v572_v13 }
 0x113   : > { %v571_v25 = vadd.f32 %v570_v20, %v516_v52 }
 0x114   : > { %v585_v24 = vor.u32 1.1754944e-38, %v584_v19  ;;  %vm583_vm8 = vcmp.eq.f32.partialorder %v582_v22, 8.507059e+37 }
 0x118   : > { %v950_v15 = vpop.eup %949 }
 0x119   : > { %v574_v16 = vmul.f32 %v950_v15, %v572_v13  ;;  %vm579_vm4 = vweird.f32 %v950_v15 }
 0x11a   : > { %vm580_vm7 = vmor %vm578_vm6, %vm579_vm4 }
 0x11b   : > { %v575_v17 = vsub.f32 1.0, %v574_v16 }
 0x11d   : > { %v576_v21 = vmul.f32 %v950_v15, %v575_v17 }
 0x11f   : > { %v577_v23 = vadd.f32 %v950_v15, %v576_v21 }
 0x121   : > { %v581_v27 = vsel %vm580_vm7, %v950_v15, %v577_v23 }
 0x122   : > { %v586_v26 = vsel %vm583_vm8, %v585_v24, %v581_v27 }
 0x123   : > { %v588_v28 = vmul.f32 %v586_v26, %v571_v25 }
 0x125   : > { %609 = vmatpush.msra.mxu0 %v588_v28 }
 0x126   : > { %865 = vmatmul.msk.f32.vlgmr.msra.gmra.mxu0 %vm590_vm9, %v589_v29 }
 0x17a   : > { %v642_v34 = vpop.f32.mrf.mxu1 }
 0x1a3   : > { %v611_v33 = vpop.f32.mrf.mxu0 }
 0x1a4   : > { %868 = vmatpush.msk.msra.mxu2 %vm621_vm10, %v611_v33 }
 0x1a5   : > { %869 = vmatmul.msk.f32.vlgmr.msra.gmra.mxu2 %vm617_vm5, %v614_v32 }
 0x228   : > { %v668_v35 = vpop.f32.mrf.mxu2 }
 0x229   : > { %v669_v36 = vadd.f32 %v668_v35, %v642_v34 }
 0x22b   : > { %v672_v37 = vsel %vm408_vm0, %v669_v36, 0.0  ;;  %v675_v38 = vmul.f32 %v669_v36, %v669_v36  ;;  %671 = vst.msk [vmem:[%s341_s18] sm:$0xff] %vm408_vm0, %v669_v36 }
 0x22c   : > { %673 = vadd.xlane.f32.xlu1 %v672_v37 }
 0x22d   : > { %978 = shalt.err (!%p975_p5)
}
 0x22e   : > { %874 = dma.vmem_to_hbm [thread:$0]  (%p1115_p4), %s705_s19, 128, %s707_s21, %s684_s27   ;;  %v676_v40 = vsel %vm408_vm0, %v675_v38, 0.0  ;;  %vm679_vm11 = vcmask 7168   ;;  %vm681_vm12 = vcmask 15360  }
 0x22f   : > { %677 = vadd.xlane.f32.xlu2 %v676_v40  ;;  %s379_s8 = scalar_lea.vmem %s1240_s7, %s858_s16 }
 0x29f   : > { %v674_v41 = vpop.xlane.xlu1 %673 }
 0x2a2   : > { %v678_v42 = vpop.xlane.xlu2 %677 }
 0x2a3   : > { %v680_v43 = vsel %vm679_vm11, %v674_v41, %v678_v42 }
 0x2a4   : > { %682 = vst.msk [vmem:[%s379_s8] sm:$0xff] %vm681_vm12, %v680_v43 }
 0x2a5 PF: > { %p880_p6 = scmp.ge.s32.totalorder %s1029_s29, 2  ;;  %s721_s11 = sand.u32 1, %s1009_s24  }
 0x2a6   : > { %s722_s19 = scalar_lea.sflag [#allocation3], %s721_s11 }
 0x2a7   : > { %p877_p4 = pnand %p880_p6, %p1122_p8 }
 0x2a9   : > { %p878_p7 = pneg %p877_p4 }
 0x2ab   : > { %1004 = dma.done.wait (%p878_p7), %s722_s19, 128  }
 0x2ac   : > { %1006 = vsyncadd (%p878_p7), %s722_s19, 4294967168  ;;  %s21_s29 = sadd.s32 1, %s1029_s29   ;;  %s1243_s24 = smov %s1013_s25 }
 0x2ad   : > { %p18_p9 = scmp.ge.s32.totalorder %s21_s29, 4   ;;  %s1244_s25 = smov %s1017_s26 }
 0x2ae   : > { %s1245_s26 = smov %s1128_s14  ;;  %s1246_s27 = smov %s1025_s28 }
 0x2af   : > { %s1247_s28 = smov %s1249_s9  ;;  %20 = sbr.rel (!%p18_p9) target bundleno = 4 (0x4), region = 100 }
 0x2b4   :  { %738 = vsyncpa [#allocation3], 1 }
 0x2b5   :  { %740 = vsyncpa [#allocation3 + $0x1], 1 }

</bundles_post_ra>
